<compile_context>
chip_gen: v6e
topology: v6e:2x2x1
jax: 0.10.0
libtpu: 0.0.40
codegen_flags: <defaults>
</compile_context>

<pallas_src>
import math
import functools

import jax
import jax.numpy as jnp
from jax.experimental import pallas as pl
from jax.experimental.pallas import tpu as pltpu


# ---------------------------------------------------------------------------
# Sinusoidal timestep embedding (standard diffusion-style embedding).
# ---------------------------------------------------------------------------
def timestep_sinusoidal_embedding(t, dim, max_period=10000.0):
    """t: (B,) or (B,1) -> (B, dim)."""
    t = jnp.reshape(t, (-1,)).astype(jnp.float32)
    half = dim // 2
    freqs = jnp.exp(-math.log(max_period) * jnp.arange(half, dtype=jnp.float32) / half)
    args = t[:, None] * freqs[None, :]
    emb = jnp.concatenate([jnp.cos(args), jnp.sin(args)], axis=-1)
    if dim % 2:
        emb = jnp.concatenate([emb, jnp.zeros_like(emb[:, :1])], axis=-1)
    return emb  # (B, dim)


# ---------------------------------------------------------------------------
# SELU (safe formulation: exp only on the clamped-negative branch), all f32.
# ---------------------------------------------------------------------------
_SELU_ALPHA = 1.6732632423543772
_SELU_SCALE = 1.0507009873554805


def _selu(v):
    return _SELU_SCALE * (
        jnp.maximum(v, 0.0) + _SELU_ALPHA * (jnp.exp(jnp.minimum(v, 0.0)) - 1.0)
    )


def _mm(a, w):
    # MXU matmul with f32 accumulation; operand dtype follows the weight,
    # which was cast once in the wrapper (bf16 on v5e/v6e/v7x by default).
    return jnp.dot(a.astype(w.dtype), w, preferred_element_type=jnp.float32)


# ---------------------------------------------------------------------------
# Pallas kernel: tb whole sets (tb*N rows) per grid step.
# ---------------------------------------------------------------------------
def deepsets_kernel(
    x_ref, tproj_ref,
    pw1x_ref, pw2_ref, pb2_ref,
    rwa_ref, rwb_ref, rbf_ref, rw2_ref, rb2_ref, rw3_ref, rb3_ref,
    out_ref,
):
    tbn, f_in = x_ref.shape            # tb*N rows, F features
    tb, _, hdim = tproj_ref.shape      # tb sets, hidden width
    n = tbn // tb                      # set size (fast path: n % 8 == 0)

    x = x_ref[...]                     # (tb*N, F) f32
    w1x = pw1x_ref[...]                # (F, H)    f32

    # --- phi layer 1: K=F is tiny, so skip the MXU and do F unrolled
    #     broadcast multiply-adds on the VPU instead. ------------------------
    a1 = x[:, 0:1] * w1x[0:1, :]
    for f in range(1, f_in):
        a1 = a1 + x[:, f:f + 1] * w1x[f:f + 1, :]
    # Add the per-set time-embedding projection (already includes pb1) with a
    # 3-D broadcast-add -- no materialized (tb*N, H) copy.
    a1 = (a1.reshape(tb, n, hdim) + tproj_ref[...]).reshape(tbn, hdim)
    h = _selu(a1)

    # --- phi layer 2 --------------------------------------------------------
    h = _selu(_mm(h, pw2_ref[...]) + pb2_ref[...])            # (tb*N, H)

    # --- phi layer 3 folded into rho layer 1 (exact identity):
    #   (h@pw3+pb3)@rw1h + (sum_n(h@pw3+pb3))@rw1p + rb1
    #     = h@(pw3@rw1h) + (sum_n h)@(pw3@rw1p) + [pb3@rw1h + N*pb3@rw1p + rb1]
    h_sum = jnp.sum(h.reshape(tb, n, hdim), axis=1)           # (tb, H) sum-pool
    pool = _mm(h_sum, rwb_ref[...]) + rbf_ref[...]            # (tb, H), once/set
    a3 = _mm(h, rwa_ref[...])                                 # (tb*N, H)
    g = _selu((a3.reshape(tb, n, hdim) + pool[:, None, :]).reshape(tbn, hdim))

    # --- rho layers 2, 3 ----------------------------------------------------
    g = _selu(_mm(g, rw2_ref[...]) + rb2_ref[...])
    g = _mm(g, rw3_ref[...]) + rb3_ref[...]                   # (tb*N, F)

    # TODO(synk): lane-dense repack of the F=4 output (e.g. a (tb*N*F/128,128)
    # slab) needs a sublane->lane relayout that Mosaic does not reliably lower;
    # the HBM side of this store is already contiguous (F is innermost), so
    # only the small strided VMEM-side writeback remains sub-optimal.
    out_ref[...] = g.astype(out_ref.dtype)


# ---------------------------------------------------------------------------
# Wrapper.
# ---------------------------------------------------------------------------
def _round_up(a, m):
    return (a + m - 1) // m * m


@functools.partial(
    jax.jit,
    static_argnames=("dim_time_embedding", "rows_per_tile", "compute_dtype"),
)
def deepsets_forward(t, x, params, dim_time_embedding=10, rows_per_tile=1024,
                     compute_dtype=jnp.bfloat16):
    """t: (B, 1), x: (B, N, F) -> (B, N, F).

    compute_dtype controls only the MXU matmul *operands* (accumulation is
    always f32, SELU/bias math stays f32).  bf16 is the right default on
    v6e/v7x (bf16-native MXU) and also gets v5e's bf16 MXU rate; pass
    jnp.float32 for exact parity with an f32 reference.
    """
    B, N, F = x.shape
    (pw1, pb1, pw2, pb2, pw3, pb3,
     rw1, rb1, rw2, rb2, rw3, rb3) = params
    H = pw1.shape[1]
    cdt = jnp.dtype(compute_dtype)

    # --- wrapper-side algebra (exact block-matrix identities) ---------------
    t_emb = timestep_sinusoidal_embedding(t, dim_time_embedding)      # (B, T)
    tproj = t_emb @ pw1[F:, :] + pb1                                  # (B, H)
    pw1x = pw1[:F, :]                                                 # (F, H)
    rw1h, rw1p = rw1[:H, :], rw1[H:, :]
    rwa = pw3 @ rw1h                                                  # (H, H)
    rwb = pw3 @ rw1p                                                  # (H, H)
    rbf = pb3 @ rw1h + float(N) * (pb3 @ rw1p) + rb1                  # (1, H)

    # --- tile selection ------------------------------------------------------
    #  * tb*N % 8 == 0 (sublane) unless a single tile covers the padded batch,
    #  * ~rows_per_tile rows/step to amortize the ~0.35us/step overhead,
    #  * keep >= 2 grid steps when B allows so the "parallel" axis spans both
    #    v7x TensorCores.
    g8 = 8 // math.gcd(N, 8)            # tb multiple of g8  =>  tb*N % 8 == 0
    tb = max(g8, (rows_per_tile // max(N, 1)) // g8 * g8)
    tb = min(tb, _round_up(B, g8))
    if B >= 2 * g8:
        tb = min(tb, max(g8, (B // 2) // g8 * g8))
    B_pad = _round_up(B, tb)
    grid = B_pad // tb

    # --- pad batch, flatten rows, cast matmul weights once ------------------
    if B_pad != B:
        x = jnp.pad(x, ((0, B_pad - B), (0, 0), (0, 0)))
        tproj = jnp.pad(tproj, ((0, B_pad - B), (0, 0)))
    x2 = x.reshape(B_pad * N, F)            # contiguous, free
    tproj3 = tproj.reshape(B_pad, 1, H)     # (B_pad,1,H): any tb is a legal block

    mxu = lambda w: w.astype(cdt)           # cast once here, not per grid step
    weight_args = [pw1x, mxu(pw2), pb2, mxu(rwa), mxu(rwb), rbf,
                   mxu(rw2), rb2, mxu(rw3), rb3]
    # NOTE: constant index_map => weights are DMA'd only once.  pl.Buffered(1)
    # would also drop their second VMEM buffer, but the ~80 KB saving is
    # irrelevant next to VMEM capacity, so it is left at the default.
    weight_specs = [
        pl.BlockSpec(w.shape, lambda b, nd=w.ndim: (0,) * nd) for w in weight_args
    ]

    # Advisory cost estimate (folded network: 3 HxH + 1 HxF matmuls per row,
    # VPU phi-L1, pooled projection once per set, 4 SELU layers).
    flops = int(2 * B_pad * N * (F * H + 3 * H * H + H * F) + 2 * B_pad * H * H)
    transc = int(4 * B_pad * N * H)
    bytes_accessed = int(
        4 * (x2.size + B_pad * N * F + tproj3.size)
        + sum(int(w.size) * w.dtype.itemsize for w in weight_args)
    )
    cost = pl.CostEstimate(
        flops=flops, transcendentals=transc, bytes_accessed=bytes_accessed
    )

    out2 = pl.pallas_call(
        deepsets_kernel,
        out_shape=jax.ShapeDtypeStruct((B_pad * N, F), x.dtype),
        grid=(grid,),
        in_specs=[
            pl.BlockSpec((tb * N, F), lambda b: (b, 0)),     # rows of tb whole sets
            pl.BlockSpec((tb, 1, H), lambda b: (b, 0, 0)),   # per-set time projection
            *weight_specs,
        ],
        out_specs=pl.BlockSpec((tb * N, F), lambda b: (b, 0)),
        compiler_params=pltpu.CompilerParams(
            dimension_semantics=("parallel",),
        ),
        cost_estimate=cost,
    )(x2, tproj3, *weight_args)

    return out2.reshape(B_pad, N, F)[:B]


# ---------------------------------------------------------------------------
# Deterministic parameter construction (synthetic init, no checkpoint).
# ---------------------------------------------------------------------------
def make_params(key, dim_features, dim_hidden, dim_time_embedding, pool="sum"):
    factor = 3 if pool == "mean_sum" else 2
    dims = [
        # phi: (F + T) -> H -> H -> H
        (dim_features + dim_time_embedding, dim_hidden),
        (dim_hidden, dim_hidden),
        (dim_hidden, dim_hidden),
        # rho: factor*H -> H -> H -> F
        (factor * dim_hidden, dim_hidden),
        (dim_hidden, dim_hidden),
        (dim_hidden, dim_features),
    ]
    params = []
    for (din, dout) in dims:
        key, kw, kb = jax.random.split(key, 3)
        w = jax.random.normal(kw, (din, dout), jnp.float32) * (1.0 / math.sqrt(din))
        b = jax.random.normal(kb, (1, dout), jnp.float32) * 0.01
        params += [w, b]
    return tuple(params)


# ---------------------------------------------------------------------------
# Pure-JAX reference (mirrors the PyTorch forward, with the original concats).
# ---------------------------------------------------------------------------
def deepsets_reference(t, x, params, dim_time_embedding=10):
    (pw1, pb1, pw2, pb2, pw3, pb3,
     rw1, rb1, rw2, rb2, rw3, rb3) = params
    B, N, F = x.shape
    t_emb = timestep_sinusoidal_embedding(t, dim_time_embedding)          # (B, T)
    t_rep = jnp.broadcast_to(t_emb[:, None, :], (B, N, t_emb.shape[-1]))  # repeat(1,N,1)
    xin = jnp.concatenate([x, t_rep], axis=-1)
    h = _selu(xin @ pw1 + pb1)
    h = _selu(h @ pw2 + pb2)
    h = h @ pw3 + pb3
    h_sum = h.sum(axis=1)                                                 # pool='sum'
    enh = jnp.concatenate([h, jnp.broadcast_to(h_sum[:, None, :], h.shape)], axis=-1)
    g = _selu(enh @ rw1 + rb1)
    g = _selu(g @ rw2 + rb2)
    g = g @ rw3 + rb3
    return g


if __name__ == "__main__":
    B, N, F = 2, 8, 4          # batch, set size, dim_features
    H, T = 64, 10              # dim_hidden (module default), dim_time_embedding

    key = jax.random.PRNGKey(0)
    kx, kt, kp = jax.random.split(key, 3)
    x = jax.random.normal(kx, (B, N, F), jnp.float32)
    t = jax.random.uniform(kt, (B, 1), jnp.float32)

    params = make_params(kp, F, H, T, pool="sum")
    ref = deepsets_reference(t, x, params, dim_time_embedding=T)

    # Exact-math path (f32 MXU operands): strict check against the reference.
    out_f32 = jax.block_until_ready(
        deepsets_forward(t, x, params, dim_time_embedding=T,
                         compute_dtype=jnp.float32))
    assert out_f32.shape == (B, N, F)
    assert jnp.allclose(out_f32, ref, atol=1e-4, rtol=1e-4), "f32 mismatch vs reference"

    # Default path (bf16 MXU operands, f32 accumulation): recommended on v6e/v7x.
    out_bf16 = jax.block_until_ready(
        deepsets_forward(t, x, params, dim_time_embedding=T))
    assert out_bf16.shape == (B, N, F)
    assert bool(jnp.all(jnp.isfinite(out_bf16)))
    assert float(jnp.max(jnp.abs(out_bf16 - ref))) < 2e-1, "bf16 path drifted too far"

    print("KERNEL_OK")
</pallas_src>

<mosaic_0001>
module attributes {stable_mosaic.version = 11 : i64} {
  func.func @deepsets_kernel(%arg0: i32, %arg1: memref<8x4xf32, #tpu.memory_space<vmem>>, %arg2: memref<1x1x64xf32, #tpu.memory_space<vmem>>, %arg3: memref<4x64xf32, #tpu.memory_space<vmem>>, %arg4: memref<64x64xf32, #tpu.memory_space<vmem>>, %arg5: memref<1x64xf32, #tpu.memory_space<vmem>>, %arg6: memref<64x64xf32, #tpu.memory_space<vmem>>, %arg7: memref<64x64xf32, #tpu.memory_space<vmem>>, %arg8: memref<1x64xf32, #tpu.memory_space<vmem>>, %arg9: memref<64x64xf32, #tpu.memory_space<vmem>>, %arg10: memref<1x64xf32, #tpu.memory_space<vmem>>, %arg11: memref<64x4xf32, #tpu.memory_space<vmem>>, %arg12: memref<1x4xf32, #tpu.memory_space<vmem>>, %arg13: memref<8x4xf32, #tpu.memory_space<vmem>>) attributes {dimension_semantics = [#tpu.dimension_semantics<parallel>], iteration_bounds = array<i64: 2>, scalar_prefetch = 0 : i64, scratch_operands = 0 : i64, tpu.core_type = #tpu.core_type<tc>, window_params = [{transform_indices = @transform_0, window_bounds = array<i64: 8, 4>}, {transform_indices = @transform_1, window_bounds = array<i64: 1, 1, 64>}, {pipeline_mode = #tpu.pipeline_mode<synchronous>, transform_indices = @transform_2, window_bounds = array<i64: 4, 64>}, {pipeline_mode = #tpu.pipeline_mode<synchronous>, transform_indices = @transform_3, window_bounds = array<i64: 64, 64>}, {pipeline_mode = #tpu.pipeline_mode<synchronous>, transform_indices = @transform_4, window_bounds = array<i64: 1, 64>}, {pipeline_mode = #tpu.pipeline_mode<synchronous>, transform_indices = @transform_5, window_bounds = array<i64: 64, 64>}, {pipeline_mode = #tpu.pipeline_mode<synchronous>, transform_indices = @transform_6, window_bounds = array<i64: 64, 64>}, {pipeline_mode = #tpu.pipeline_mode<synchronous>, transform_indices = @transform_7, window_bounds = array<i64: 1, 64>}, {pipeline_mode = #tpu.pipeline_mode<synchronous>, transform_indices = @transform_8, window_bounds = array<i64: 64, 64>}, {pipeline_mode = #tpu.pipeline_mode<synchronous>, transform_indices = @transform_9, window_bounds = array<i64: 1, 64>}, {pipeline_mode = #tpu.pipeline_mode<synchronous>, transform_indices = @transform_10, window_bounds = array<i64: 64, 4>}, {pipeline_mode = #tpu.pipeline_mode<synchronous>, transform_indices = @transform_11, window_bounds = array<i64: 1, 4>}, {transform_indices = @transform_12, window_bounds = array<i64: 8, 4>}]} {
    %c0 = arith.constant 0 : index
    %c0_0 = arith.constant 0 : index
    %0 = vector.load %arg1[%c0, %c0_0] : memref<8x4xf32, #tpu.memory_space<vmem>>, vector<8x4xf32>
    %c0_1 = arith.constant 0 : index
    %c0_2 = arith.constant 0 : index
    %1 = vector.load %arg3[%c0_1, %c0_2] : memref<4x64xf32, #tpu.memory_space<vmem>>, vector<4x64xf32>
    %2 = vector.extract_strided_slice %0 {offsets = [0, 0], sizes = [8, 1], strides = [1, 1]} : vector<8x4xf32> to vector<8x1xf32>
    %3 = vector.extract_strided_slice %1 {offsets = [0, 0], sizes = [1, 64], strides = [1, 1]} : vector<4x64xf32> to vector<1x64xf32>
    %4 = vector.broadcast %2 : vector<8x1xf32> to vector<8x64xf32>
    %5 = vector.broadcast %3 : vector<1x64xf32> to vector<8x64xf32>
    %6 = arith.mulf %4, %5 : vector<8x64xf32>
    %7 = vector.extract_strided_slice %0 {offsets = [0, 1], sizes = [8, 1], strides = [1, 1]} : vector<8x4xf32> to vector<8x1xf32>
    %8 = vector.extract_strided_slice %1 {offsets = [1, 0], sizes = [1, 64], strides = [1, 1]} : vector<4x64xf32> to vector<1x64xf32>
    %9 = vector.broadcast %7 : vector<8x1xf32> to vector<8x64xf32>
    %10 = vector.broadcast %8 : vector<1x64xf32> to vector<8x64xf32>
    %11 = arith.mulf %9, %10 : vector<8x64xf32>
    %12 = arith.addf %6, %11 : vector<8x64xf32>
    %13 = vector.extract_strided_slice %0 {offsets = [0, 2], sizes = [8, 1], strides = [1, 1]} : vector<8x4xf32> to vector<8x1xf32>
    %14 = vector.extract_strided_slice %1 {offsets = [2, 0], sizes = [1, 64], strides = [1, 1]} : vector<4x64xf32> to vector<1x64xf32>
    %15 = vector.broadcast %13 : vector<8x1xf32> to vector<8x64xf32>
    %16 = vector.broadcast %14 : vector<1x64xf32> to vector<8x64xf32>
    %17 = arith.mulf %15, %16 : vector<8x64xf32>
    %18 = arith.addf %12, %17 : vector<8x64xf32>
    %19 = vector.extract_strided_slice %0 {offsets = [0, 3], sizes = [8, 1], strides = [1, 1]} : vector<8x4xf32> to vector<8x1xf32>
    %20 = vector.extract_strided_slice %1 {offsets = [3, 0], sizes = [1, 64], strides = [1, 1]} : vector<4x64xf32> to vector<1x64xf32>
    %21 = vector.broadcast %19 : vector<8x1xf32> to vector<8x64xf32>
    %22 = vector.broadcast %20 : vector<1x64xf32> to vector<8x64xf32>
    %23 = arith.mulf %21, %22 : vector<8x64xf32>
    %24 = arith.addf %18, %23 : vector<8x64xf32>
    %25 = vector.shape_cast %24 : vector<8x64xf32> to vector<1x8x64xf32>
    %c0_3 = arith.constant 0 : index
    %c0_4 = arith.constant 0 : index
    %c0_5 = arith.constant 0 : index
    %26 = vector.load %arg2[%c0_3, %c0_4, %c0_5] : memref<1x1x64xf32, #tpu.memory_space<vmem>>, vector<1x1x64xf32>
    %27 = vector.broadcast %26 : vector<1x1x64xf32> to vector<1x8x64xf32>
    %28 = arith.addf %25, %27 : vector<1x8x64xf32>
    %29 = vector.shape_cast %28 : vector<1x8x64xf32> to vector<8x64xf32>
    %cst = arith.constant 0.000000e+00 : f32
    %30 = vector.broadcast %cst : f32 to vector<8x64xf32>
    %31 = arith.maximumf %29, %30 : vector<8x64xf32>
    %cst_6 = arith.constant 0.000000e+00 : f32
    %32 = vector.broadcast %cst_6 : f32 to vector<8x64xf32>
    %33 = arith.minimumf %29, %32 : vector<8x64xf32>
    %34 = math.exp %33 : vector<8x64xf32>
    %cst_7 = arith.constant 1.000000e+00 : f32
    %35 = vector.broadcast %cst_7 : f32 to vector<8x64xf32>
    %36 = arith.subf %34, %35 : vector<8x64xf32>
    %cst_8 = arith.constant 1.67326319 : f32
    %37 = vector.broadcast %cst_8 : f32 to vector<8x64xf32>
    %38 = arith.mulf %37, %36 : vector<8x64xf32>
    %39 = arith.addf %31, %38 : vector<8x64xf32>
    %cst_9 = arith.constant 1.05070102 : f32
    %40 = vector.broadcast %cst_9 : f32 to vector<8x64xf32>
    %41 = arith.mulf %40, %39 : vector<8x64xf32>
    %c0_10 = arith.constant 0 : index
    %c0_11 = arith.constant 0 : index
    %42 = vector.load %arg4[%c0_10, %c0_11] : memref<64x64xf32, #tpu.memory_space<vmem>>, vector<64x64xf32>
    %cst_12 = arith.constant dense<0.000000e+00> : vector<8x64xf32>
    %43 = tpu.matmul %41, %42, %cst_12 {dimension_numbers = #tpu.dot_dimension_numbers<[1], [0], [0], [1], [0, 0, 1, 1], [], []>} : vector<8x64xf32>, vector<64x64xf32>, vector<8x64xf32> -> vector<8x64xf32>
    %c0_13 = arith.constant 0 : index
    %c0_14 = arith.constant 0 : index
    %44 = vector.load %arg5[%c0_13, %c0_14] : memref<1x64xf32, #tpu.memory_space<vmem>>, vector<1x64xf32>
    %45 = vector.broadcast %44 : vector<1x64xf32> to vector<8x64xf32>
    %46 = arith.addf %43, %45 : vector<8x64xf32>
    %cst_15 = arith.constant 0.000000e+00 : f32
    %47 = vector.broadcast %cst_15 : f32 to vector<8x64xf32>
    %48 = arith.maximumf %46, %47 : vector<8x64xf32>
    %cst_16 = arith.constant 0.000000e+00 : f32
    %49 = vector.broadcast %cst_16 : f32 to vector<8x64xf32>
    %50 = arith.minimumf %46, %49 : vector<8x64xf32>
    %51 = math.exp %50 : vector<8x64xf32>
    %cst_17 = arith.constant 1.000000e+00 : f32
    %52 = vector.broadcast %cst_17 : f32 to vector<8x64xf32>
    %53 = arith.subf %51, %52 : vector<8x64xf32>
    %cst_18 = arith.constant 1.67326319 : f32
    %54 = vector.broadcast %cst_18 : f32 to vector<8x64xf32>
    %55 = arith.mulf %54, %53 : vector<8x64xf32>
    %56 = arith.addf %48, %55 : vector<8x64xf32>
    %cst_19 = arith.constant 1.05070102 : f32
    %57 = vector.broadcast %cst_19 : f32 to vector<8x64xf32>
    %58 = arith.mulf %57, %56 : vector<8x64xf32>
    %59 = vector.shape_cast %58 : vector<8x64xf32> to vector<1x8x64xf32>
    %cst_20 = arith.constant dense<0.000000e+00> : vector<1x64xf32>
    %60 = vector.multi_reduction <add>, %59, %cst_20 [1] : vector<1x8x64xf32> to vector<1x64xf32>
    %c0_21 = arith.constant 0 : index
    %c0_22 = arith.constant 0 : index
    %61 = vector.load %arg7[%c0_21, %c0_22] : memref<64x64xf32, #tpu.memory_space<vmem>>, vector<64x64xf32>
    %cst_23 = arith.constant dense<0.000000e+00> : vector<1x64xf32>
    %62 = tpu.matmul %60, %61, %cst_23 {dimension_numbers = #tpu.dot_dimension_numbers<[1], [0], [0], [1], [0, 0, 1, 1], [], []>} : vector<1x64xf32>, vector<64x64xf32>, vector<1x64xf32> -> vector<1x64xf32>
    %c0_24 = arith.constant 0 : index
    %c0_25 = arith.constant 0 : index
    %63 = vector.load %arg8[%c0_24, %c0_25] : memref<1x64xf32, #tpu.memory_space<vmem>>, vector<1x64xf32>
    %64 = arith.addf %62, %63 : vector<1x64xf32>
    %c0_26 = arith.constant 0 : index
    %c0_27 = arith.constant 0 : index
    %65 = vector.load %arg6[%c0_26, %c0_27] : memref<64x64xf32, #tpu.memory_space<vmem>>, vector<64x64xf32>
    %cst_28 = arith.constant dense<0.000000e+00> : vector<8x64xf32>
    %66 = tpu.matmul %58, %65, %cst_28 {dimension_numbers = #tpu.dot_dimension_numbers<[1], [0], [0], [1], [0, 0, 1, 1], [], []>} : vector<8x64xf32>, vector<64x64xf32>, vector<8x64xf32> -> vector<8x64xf32>
    %67 = vector.shape_cast %66 : vector<8x64xf32> to vector<1x8x64xf32>
    %68 = vector.shape_cast %64 : vector<1x64xf32> to vector<1x1x64xf32>
    %69 = vector.broadcast %68 : vector<1x1x64xf32> to vector<1x8x64xf32>
    %70 = arith.addf %67, %69 : vector<1x8x64xf32>
    %71 = vector.shape_cast %70 : vector<1x8x64xf32> to vector<8x64xf32>
    %cst_29 = arith.constant 0.000000e+00 : f32
    %72 = vector.broadcast %cst_29 : f32 to vector<8x64xf32>
    %73 = arith.maximumf %71, %72 : vector<8x64xf32>
    %cst_30 = arith.constant 0.000000e+00 : f32
    %74 = vector.broadcast %cst_30 : f32 to vector<8x64xf32>
    %75 = arith.minimumf %71, %74 : vector<8x64xf32>
    %76 = math.exp %75 : vector<8x64xf32>
    %cst_31 = arith.constant 1.000000e+00 : f32
    %77 = vector.broadcast %cst_31 : f32 to vector<8x64xf32>
    %78 = arith.subf %76, %77 : vector<8x64xf32>
    %cst_32 = arith.constant 1.67326319 : f32
    %79 = vector.broadcast %cst_32 : f32 to vector<8x64xf32>
    %80 = arith.mulf %79, %78 : vector<8x64xf32>
    %81 = arith.addf %73, %80 : vector<8x64xf32>
    %cst_33 = arith.constant 1.05070102 : f32
    %82 = vector.broadcast %cst_33 : f32 to vector<8x64xf32>
    %83 = arith.mulf %82, %81 : vector<8x64xf32>
    %c0_34 = arith.constant 0 : index
    %c0_35 = arith.constant 0 : index
    %84 = vector.load %arg9[%c0_34, %c0_35] : memref<64x64xf32, #tpu.memory_space<vmem>>, vector<64x64xf32>
    %cst_36 = arith.constant dense<0.000000e+00> : vector<8x64xf32>
    %85 = tpu.matmul %83, %84, %cst_36 {dimension_numbers = #tpu.dot_dimension_numbers<[1], [0], [0], [1], [0, 0, 1, 1], [], []>} : vector<8x64xf32>, vector<64x64xf32>, vector<8x64xf32> -> vector<8x64xf32>
    %c0_37 = arith.constant 0 : index
    %c0_38 = arith.constant 0 : index
    %86 = vector.load %arg10[%c0_37, %c0_38] : memref<1x64xf32, #tpu.memory_space<vmem>>, vector<1x64xf32>
    %87 = vector.broadcast %86 : vector<1x64xf32> to vector<8x64xf32>
    %88 = arith.addf %85, %87 : vector<8x64xf32>
    %cst_39 = arith.constant 0.000000e+00 : f32
    %89 = vector.broadcast %cst_39 : f32 to vector<8x64xf32>
    %90 = arith.maximumf %88, %89 : vector<8x64xf32>
    %cst_40 = arith.constant 0.000000e+00 : f32
    %91 = vector.broadcast %cst_40 : f32 to vector<8x64xf32>
    %92 = arith.minimumf %88, %91 : vector<8x64xf32>
    %93 = math.exp %92 : vector<8x64xf32>
    %cst_41 = arith.constant 1.000000e+00 : f32
    %94 = vector.broadcast %cst_41 : f32 to vector<8x64xf32>
    %95 = arith.subf %93, %94 : vector<8x64xf32>
    %cst_42 = arith.constant 1.67326319 : f32
    %96 = vector.broadcast %cst_42 : f32 to vector<8x64xf32>
    %97 = arith.mulf %96, %95 : vector<8x64xf32>
    %98 = arith.addf %90, %97 : vector<8x64xf32>
    %cst_43 = arith.constant 1.05070102 : f32
    %99 = vector.broadcast %cst_43 : f32 to vector<8x64xf32>
    %100 = arith.mulf %99, %98 : vector<8x64xf32>
    %c0_44 = arith.constant 0 : index
    %c0_45 = arith.constant 0 : index
    %101 = vector.load %arg11[%c0_44, %c0_45] : memref<64x4xf32, #tpu.memory_space<vmem>>, vector<64x4xf32>
    %cst_46 = arith.constant dense<0.000000e+00> : vector<8x4xf32>
    %102 = tpu.matmul %100, %101, %cst_46 {dimension_numbers = #tpu.dot_dimension_numbers<[1], [0], [0], [1], [0, 0, 1, 1], [], []>} : vector<8x64xf32>, vector<64x4xf32>, vector<8x4xf32> -> vector<8x4xf32>
    %c0_47 = arith.constant 0 : index
    %c0_48 = arith.constant 0 : index
    %103 = vector.load %arg12[%c0_47, %c0_48] : memref<1x4xf32, #tpu.memory_space<vmem>>, vector<1x4xf32>
    %104 = vector.broadcast %103 : vector<1x4xf32> to vector<8x4xf32>
    %105 = arith.addf %102, %104 : vector<8x4xf32>
    %c0_49 = arith.constant 0 : index
    %c0_50 = arith.constant 0 : index
    %106 = vector.load %arg13[%c0_49, %c0_50] : memref<8x4xf32, #tpu.memory_space<vmem>>, vector<8x4xf32>
    tpu.vector_store %arg13[%c0_49, %c0_50], %105 {strides = array<i32>} : memref<8x4xf32, #tpu.memory_space<vmem>>, vector<8x4xf32>,
    return
  }
  func.func @transform_0(%arg0: i32) -> (i32, i32) {
    %c0_i32 = arith.constant 0 : i32
    %c0_i32_0 = arith.constant 0 : i32
    return %arg0, %c0_i32 : i32, i32
  }
  func.func @transform_1(%arg0: i32) -> (i32, i32, i32) {
    %c0_i32 = arith.constant 0 : i32
    %c0_i32_0 = arith.constant 0 : i32
    %c0_i32_1 = arith.constant 0 : i32
    return %arg0, %c0_i32, %c0_i32_0 : i32, i32, i32
  }
  func.func @transform_2(%arg0: i32) -> (i32, i32) {
    %c0_i32 = arith.constant 0 : i32
    %c0_i32_0 = arith.constant 0 : i32
    %c0_i32_1 = arith.constant 0 : i32
    return %c0_i32, %c0_i32_0 : i32, i32
  }
  func.func @transform_3(%arg0: i32) -> (i32, i32) {
    %c0_i32 = arith.constant 0 : i32
    %c0_i32_0 = arith.constant 0 : i32
    %c0_i32_1 = arith.constant 0 : i32
    return %c0_i32, %c0_i32_0 : i32, i32
  }
  func.func @transform_4(%arg0: i32) -> (i32, i32) {
    %c0_i32 = arith.constant 0 : i32
    %c0_i32_0 = arith.constant 0 : i32
    %c0_i32_1 = arith.constant 0 : i32
    return %c0_i32, %c0_i32_0 : i32, i32
  }
  func.func @transform_5(%arg0: i32) -> (i32, i32) {
    %c0_i32 = arith.constant 0 : i32
    %c0_i32_0 = arith.constant 0 : i32
    %c0_i32_1 = arith.constant 0 : i32
    return %c0_i32, %c0_i32_0 : i32, i32
  }
  func.func @transform_6(%arg0: i32) -> (i32, i32) {
    %c0_i32 = arith.constant 0 : i32
    %c0_i32_0 = arith.constant 0 : i32
    %c0_i32_1 = arith.constant 0 : i32
    return %c0_i32, %c0_i32_0 : i32, i32
  }
  func.func @transform_7(%arg0: i32) -> (i32, i32) {
    %c0_i32 = arith.constant 0 : i32
    %c0_i32_0 = arith.constant 0 : i32
    %c0_i32_1 = arith.constant 0 : i32
    return %c0_i32, %c0_i32_0 : i32, i32
  }
  func.func @transform_8(%arg0: i32) -> (i32, i32) {
    %c0_i32 = arith.constant 0 : i32
    %c0_i32_0 = arith.constant 0 : i32
    %c0_i32_1 = arith.constant 0 : i32
    return %c0_i32, %c0_i32_0 : i32, i32
  }
  func.func @transform_9(%arg0: i32) -> (i32, i32) {
    %c0_i32 = arith.constant 0 : i32
    %c0_i32_0 = arith.constant 0 : i32
    %c0_i32_1 = arith.constant 0 : i32
    return %c0_i32, %c0_i32_0 : i32, i32
  }
  func.func @transform_10(%arg0: i32) -> (i32, i32) {
    %c0_i32 = arith.constant 0 : i32
    %c0_i32_0 = arith.constant 0 : i32
    %c0_i32_1 = arith.constant 0 : i32
    return %c0_i32, %c0_i32_0 : i32, i32
  }
  func.func @transform_11(%arg0: i32) -> (i32, i32) {
    %c0_i32 = arith.constant 0 : i32
    %c0_i32_0 = arith.constant 0 : i32
    %c0_i32_1 = arith.constant 0 : i32
    return %c0_i32, %c0_i32_0 : i32, i32
  }
  func.func @transform_12(%arg0: i32) -> (i32, i32) {
    %c0_i32 = arith.constant 0 : i32
    %c0_i32_0 = arith.constant 0 : i32
    return %arg0, %c0_i32 : i32, i32
  }
}

</mosaic_0001>

<bundles_post_ra>
// kernel: deepsets_forward.1
= control target key start
LH: loop header
LB: loop body
LE: loop exit
PB: predicated region body
PF: predicated region fallthrough
CT: control target
= control target key end

     0   :  { %s1277_s21 = smov 0   ;;  %s1506_s0 = inlined_call_operand.vmem [shape: f32[16,4], index: 0, kind: input, shape index: {}]   ;;  %s1507_s1 = inlined_call_operand.vmem [shape: f32[2,1,64], index: 1, kind: input, shape index: {}]   ;;  %s1508_s2 = inlined_call_operand.vmem [shape: f32[4,64], index: 2, kind: input, shape index: {}]   ;;  %s1509_s3 = inlined_call_operand.vmem [shape: f32[64,64], index: 3, kind: input, shape index: {}]   ;;  %s1510_s4 = inlined_call_operand.vmem [shape: f32[1,64], index: 4, kind: input, shape index: {}]   ;;  %s1511_s5 = inlined_call_operand.vmem [shape: f32[64,64], index: 5, kind: input, shape index: {}]   ;;  %s1512_s6 = inlined_call_operand.vmem [shape: f32[64,64], index: 6, kind: input, shape index: {}]   ;;  %s1513_s7 = inlined_call_operand.vmem [shape: f32[1,64], index: 7, kind: input, shape index: {}]   ;;  %s1514_s8 = inlined_call_operand.vmem [shape: f32[64,64], index: 8, kind: input, shape index: {}]   ;;  %s1515_s9 = inlined_call_operand.vmem [shape: f32[1,64], index: 9, kind: input, shape index: {}]   ;;  %s1516_s10 = inlined_call_operand.vmem [shape: f32[64,4], index: 10, kind: input, shape index: {}]   ;;  %s1517_s11 = inlined_call_operand.vmem [shape: f32[1,4], index: 11, kind: input, shape index: {}]   ;;  %s1518_s12 = inlined_call_operand.vmem [shape: f32[16,4], index: 12, kind: output, shape index: {}]  }
   0x1 LB: > { %s1009_s22 = sadd.s32 4294967295, %s1204_s21   ;;  %p1013_p0 = scmp.ge.s32.totalorder %s1204_s21, 1  ;;  %s1204_s21 = sphi %s1277_s21, %s22_s21  }
   0x2   : > { %p369_p1 = scmp.lt.s32.totalorder %s1204_s21, 3 }
   0x4   : > { %p370_p2 = pnand %p1013_p0, %p369_p1 }
   0x5   : > { %p412_p3 = scmp.lt.s32.totalorder (!%p370_p2), %s1009_s22, 1 }
   0x6   : > { %373 = sbr.rel (%p370_p2) target bundleno = 1056 (0x420), region = 68 }
   0xb   : > { %v1206_v0 = vmov 0   ;;  %v1207_v1 = vmov 2   ;;  %s1520_s22 = smov (!%p412_p3, %s1009_s22), 1  ;;  %v1208_v3 = vmov 1   ;;  %v1209_v4 = vmov 3   ;;  %v488_v5 = vld [vmem:[%s1509_s3 + $0x38] sm:$0xff] }
   0xc   : > { %1185 = vset.pattern.permute.xlu0 %v1206_v0  ;;  %1187 = vset.pattern.permute.xlu1 %v1207_v1  ;;  %s1014_s23 = sshll.u32 %s1520_s22, 3  ;;  %v1210_v6 = vmov 0.0   ;;  %v487_v7 = vld [vmem:[%s1509_s3 + $0x30] sm:$0xff]  ;;  %vm1211_vm0 = vmmov 0   ;;  %v486_v8 = vld [vmem:[%s1509_s3 + $0x28] sm:$0xff]  ;;  %v485_v9 = vld [vmem:[%s1509_s3 + $0x20] sm:$0xff]  ;;  %v430_v14 = vlaneseq  ;;  %s418_s14 = scalar_lea.vmem %s1507_s1, %s1520_s22 }
   0xd   : > { %s415_s26 = scalar_lea.vmem %s1506_s0, %s1014_s23  ;;  %1076 = vmatprep.subr.mxu0 %v1210_v6  ;;  %1092 = vmatprep.mubr.msk.f32.mxu0 %vm1211_vm0, %v1210_v6  ;;  %v484_v10 = vld [vmem:[%s1509_s3 + $0x18] sm:$0xff]  ;;  %v483_v11 = vld [vmem:[%s1509_s3 + $0x10] sm:$0xff]  ;;  %v482_v12 = vld [vmem:[%s1509_s3 + $0x8] sm:$0xff]  ;;  %vm496_vm1 = vcmask 523264   ;;  %vm945_vm2 = vcmask 31744  }
   0xe   : > { %v423_v2 = vld [vmem:[%s415_s26] sm:$0xff]  ;;  %1077 = vmatpush3.msra.mxu0 %v488_v5  ;;  %1095 = vmatprep.subr.mxu1 %v1210_v6  ;;  %v1331_v15 = vshrl.u32 %v430_v14, 7  ;;  %v674_v46 = vld [vmem:[%s1511_s5 + $0x38] sm:$0xff]  ;;  %v673_v47 = vld [vmem:[%s1511_s5 + $0x30] sm:$0xff] }
   0xf   : > { %427 = vperm.xlu0 %1185, %v423_v2   ;;  %446 = vperm.xlu1 %1187, %v423_v2   ;;  %v481_v13 = vld [vmem:[%s1509_s3] sm:$0xff]  ;;  %v672_v48 = vld [vmem:[%s1511_s5 + $0x28] sm:$0xff]  ;;  %v670_v50 = vld [vmem:[%s1511_s5 + $0x18] sm:$0xff] }
  0x10   : > { %1078 = vmatprep.subr.mxu0 %v1210_v6  ;;  %1111 = vmatprep.mubr.msk.f32.mxu1 %vm1211_vm0, %v1210_v6  ;;  %v432_v16 = vsub.s32 0, %v1331_v15  ;;  %v441_v17 = vsub.s32 1, %v1331_v15  ;;  %v424_v18 = vld [vmem:[%s1508_s2] sm:$0xf]  ;;  %v451_v20 = vsub.s32 2, %v1331_v15  ;;  %v461_v22 = vsub.s32 3, %v1331_v15 }
  0x11   : > { %1079 = vmatpush3.msra.mxu0 %v487_v7  ;;  %v1016_v35 = vld [vmem:[%s418_s14] ss:$0 sm:$0xff]  ;;  %v669_v51 = vld [vmem:[%s1511_s5 + $0x10] sm:$0xff]  ;;  %v668_v52 = vld [vmem:[%s1511_s5 + $0x8] sm:$0xff]  ;;  %s422_s14 = scalar_lea.vmem %s1518_s12, %s1014_s23 }
  0x12   : > { %1080 = vmatprep.subr.mxu0 %v1210_v6  ;;  %v433_v23 = vrot.slane %v424_v18, %v432_v16  ;;  %v442_v24 = vrot.slane %v424_v18, %v441_v17  ;;  %v452_v25 = vrot.slane %v424_v18, %v451_v20  ;;  %v462_v26 = vrot.slane %v424_v18, %v461_v22  ;;  %v671_v49 = vld [vmem:[%s1511_s5 + $0x20] sm:$0xff]  ;;  %v592_v53 = vld [vmem:[%s1512_s6 + $0x38] sm:$0xff]  ;;  %v591_v55 = vld [vmem:[%s1512_s6 + $0x30] sm:$0xff] }
  0x13   : > { %1186 = vset.pattern.permute.xlu0 %v1208_v3  ;;  %1188 = vset.pattern.permute.xlu1 %v1209_v4  ;;  %v667_v54 = vld [vmem:[%s1511_s5] sm:$0xff]  ;;  %v590_v56 = vld [vmem:[%s1512_s6 + $0x28] sm:$0xff]  ;;  %v588_v58 = vld [vmem:[%s1512_s6 + $0x18] sm:$0xff] }
  0x14   : > { %436 = vperm.xlu0 %1186, %v423_v2   ;;  %456 = vperm.xlu1 %1188, %v423_v2   ;;  %v589_v57 = vld [vmem:[%s1512_s6 + $0x20] sm:$0xff]  ;;  %v587_v59 = vld [vmem:[%s1512_s6 + $0x10] sm:$0xff]  ;;  %v586_v60 = vld [vmem:[%s1512_s6 + $0x8] sm:$0xff] }
  0x15   : > { %1081 = vmatpush3.msra.mxu0 %v486_v8  ;;  %1096 = vmatpush3.msra.mxu1 %v592_v53  ;;  %v585_v61 = vld [vmem:[%s1512_s6] sm:$0xff]  ;;  %v768_v20 = vld [vmem:[%s1514_s8 + $0x38] sm:$0xff]  ;;  %v766_v22 = vld [vmem:[%s1514_s8 + $0x28] sm:$0xff] }
  0x16   : > { %1082 = vmatprep.subr.mxu0 %v1210_v6  ;;  %1097 = vmatprep.subr.mxu1 %v1210_v6  ;;  %v1018_v62 = vld [vmem:[%s1510_s4] ss:$0 sm:$0xff]  ;;  %v863_v15 = vld [vmem:[%s1516_s10 + $0x30] sm:$0xff] }
  0x17   : > { %1083 = vmatpush3.msra.mxu0 %v485_v9  ;;  %1098 = vmatpush3.msra.mxu1 %v591_v55 }
  0x18   : > { %1189 = vset.pattern.permute.xlu0 %v1209_v4  ;;  %1084 = vmatprep.subr.mxu0 %v1210_v6 }
  0x19   : > { %1085 = vmatpush3.msra.mxu0 %v484_v10  ;;  %1099 = vmatprep.subr.mxu1 %v1210_v6 }
  0x1a   : > { %1086 = vmatprep.subr.mxu0 %v1210_v6  ;;  %1100 = vmatpush3.msra.mxu1 %v590_v56 }
  0x1b   : > { %1087 = vmatpush3.msra.mxu0 %v483_v11  ;;  %1101 = vmatprep.subr.mxu1 %v1210_v6 }
  0x1c   : > { %1088 = vmatprep.subr.mxu0 %v1210_v6  ;;  %1102 = vmatpush3.msra.mxu1 %v589_v57 }
  0x1d   : > { %1089 = vmatpush3.msra.mxu0 %v482_v12  ;;  %1103 = vmatprep.subr.mxu1 %v1210_v6 }
  0x1e   : > { %1090 = vmatprep.subr.mxu0 %v1210_v6  ;;  %1104 = vmatpush3.msra.mxu1 %v588_v58 }
  0x1f   : > { %1091 = vmatpush3.msra.mxu0 %v481_v13  ;;  %1105 = vmatprep.subr.mxu1 %v1210_v6 }
  0x20   : > { %1114 = vmatprep.subr.mxu0 %v1210_v6  ;;  %1106 = vmatpush3.msra.mxu1 %v587_v59 }
  0x21   : > { %1107 = vmatprep.subr.mxu1 %v1210_v6 }
  0x22   : > { %1108 = vmatpush3.msra.mxu1 %v586_v60 }
  0x23   : > { %1109 = vmatprep.subr.mxu1 %v1210_v6 }
  0x24   : > { %1110 = vmatpush3.msra.mxu1 %v585_v61  ;;  %v1027_v61 = vld [vmem:[%s1517_s11] ss:$0 sm:$0xff] }
  0x25   : > { %1133 = vmatprep.subr.mxu1 %v1210_v6 }
  0x8a   : > { %v428_v19 = vpop.permute.xlu0 %427  ;;  %v447_v21 = vpop.permute.xlu1 %446 }
  0x8b   : > { %v434_v29 = vmul.f32 %v433_v23, %v428_v19  ;;  %v453_v31 = vmul.f32 %v452_v25, %v447_v21  ;;  %v767_v21 = vld [vmem:[%s1514_s8 + $0x30] sm:$0xff]  ;;  %v765_v23 = vld [vmem:[%s1514_s8 + $0x20] sm:$0xff] }
  0x8c   : > { %v763_v25 = vld [vmem:[%s1514_s8 + $0x10] sm:$0xff] }
  0x8f   : > { %v437_v27 = vpop.permute.xlu0 %436  ;;  %v457_v28 = vpop.permute.xlu1 %456 }
  0x90   : > { %v443_v30 = vmul.f32 %v442_v24, %v437_v27  ;;  %v463_v33 = vmul.f32 %v462_v26, %v457_v28  ;;  %v764_v24 = vld [vmem:[%s1514_s8 + $0x18] sm:$0xff]  ;;  %v762_v26 = vld [vmem:[%s1514_s8 + $0x8] sm:$0xff]  ;;  %v761_v27 = vld [vmem:[%s1514_s8] sm:$0xff] }
  0x92   : > { %v444_v32 = vadd.f32 %v443_v30, %v434_v29  ;;  %v593_v30 = vld [vmem:[%s1513_s7] sm:$0x1] }
  0x94   : > { %v454_v34 = vadd.f32 %v453_v31, %v444_v32 }
  0x96   : > { %v464_v36 = vadd.f32 %v463_v33, %v454_v34 }
  0x98   : > { %v472_v37 = vadd.f32 %v1016_v35, %v464_v36 }
  0x9a   : > { %v474_v38 = vmin.f32 %v472_v37, 0.0  ;;  %v473_v42 = vmax.f32 %v472_v37, 0.0 }
  0x9c   : > { %v475_v39 = vmul.f32 1.442695, %v474_v38 }
  0x9e   : > { %1190 = vpow2.f32 %v475_v39 }
  0xab   : > { %v1191_v40 = vpop.eup %1190 }
  0xac   : > { %v1017_v41 = vadd.f32 -1.0, %v1191_v40 }
  0xae   : > { %v478_v43 = vmul.f32 1.6732632, %v1017_v41 }
  0xb0   : > { %v479_v44 = vadd.f32 %v478_v43, %v473_v42 }
  0xb2   : > { %v480_v45 = vmul.f32 1.050701, %v479_v44  ;;  %v864_v44 = vld [vmem:[%s1516_s10 + $0x38] sm:$0xff] }
  0xb4   : > { %1093 = vmatmul.mubr.msk.f32.vlgmr.msra.gmra.mxu0 %vm496_vm1, %v480_v45  ;;  %v861_v45 = vld [vmem:[%s1516_s10 + $0x20] sm:$0xff] }
  0xb5   : > { %1130 = vmatprep.mubr.msk.f32.mxu0 %vm1211_vm0, %v1210_v6  ;;  %1115 = vmatpush3.msra.mxu0 %v674_v46  ;;  %v860_v46 = vld [vmem:[%s1516_s10 + $0x18] sm:$0xff] }
  0xb6   : > { %1116 = vmatprep.subr.mxu0 %v1210_v6 }
  0xb7   : > { %1117 = vmatpush3.msra.mxu0 %v673_v47  ;;  %v859_v47 = vld [vmem:[%s1516_s10 + $0x10] sm:$0xff] }
  0xb8   : > { %1118 = vmatprep.subr.mxu0 %v1210_v6 }
  0xb9   : > { %1119 = vmatpush3.msra.mxu0 %v672_v48  ;;  %v858_v48 = vld [vmem:[%s1516_s10 + $0x8] sm:$0xff] }
  0xba   : > { %1120 = vmatprep.subr.mxu0 %v1210_v6 }
  0xbb   : > { %1121 = vmatpush3.msra.mxu0 %v671_v49  ;;  %v857_v49 = vld [vmem:[%s1516_s10] sm:$0xff] }
  0xbc   : > { %1122 = vmatprep.subr.mxu0 %v1210_v6 }
  0xbd   : > { %1123 = vmatpush3.msra.mxu0 %v670_v50  ;;  %v1024_v50 = vld [vmem:[%s1515_s9] ss:$0 sm:$0xff] }
  0xbe   : > { %1124 = vmatprep.subr.mxu0 %v1210_v6 }
  0xbf   : > { %1125 = vmatpush3.msra.mxu0 %v669_v51 }
  0xc0   : > { %1126 = vmatprep.subr.mxu0 %v1210_v6 }
  0xc1   : > { %1127 = vmatpush3.msra.mxu0 %v668_v52 }
  0xc2   : > { %1128 = vmatprep.subr.mxu0 %v1210_v6 }
  0xc3   : > { %1129 = vmatpush3.msra.mxu0 %v667_v54 }
  0xc4   : > { %1152 = vmatprep.subr.mxu0 %v1210_v6 }
 0x174   : > { %v566_v63 = vpop.f32.mrf.mxu0 }
 0x175   : > { %v567_v0 = vadd.f32 %v1018_v62, %v566_v63 }
 0x176   : > { %v1094_v1 = vpop.f32.mrf.mxu0 }
 0x177   : > { %v571_v2 = vmin.f32 %v567_v0, 0.0  ;;  %v570_v7 = vmax.f32 %v567_v0, 0.0 }
 0x179   : > { %v572_v3 = vmul.f32 1.442695, %v571_v2 }
 0x17b   : > { %1192 = vpow2.f32 %v572_v3 }
 0x188   : > { %v1193_v4 = vpop.eup %1192 }
 0x189   : > { %v1020_v5 = vadd.f32 -1.0, %v1193_v4 }
 0x18b   : > { %v575_v8 = vmul.f32 1.6732632, %v1020_v5 }
 0x18d   : > { %v576_v9 = vadd.f32 %v575_v8, %v570_v7 }
 0x18f   : > { %v577_v10 = vmul.f32 1.050701, %v576_v9 }
 0x191   : > { %v578_v11 = vsel %vm496_vm1, %v577_v10, 0.0  ;;  %1131 = vmatmul.mubr.msk.f32.vlgmr.msra.gmra.mxu0 %vm496_vm1, %v577_v10 }
 0x192   : > { %v579_v12 = vrot.slane %v578_v11, 4  ;;  %1168 = vmatprep.mubr.msk.f32.mxu0 %vm1211_vm0, %v1210_v6  ;;  %1153 = vmatpush3.msra.mxu0 %v864_v44 }
 0x193   : > { %1154 = vmatprep.subr.mxu0 %v1210_v6 }
 0x194   : > { %v580_v13 = vadd.f32 %v579_v12, %v578_v11  ;;  %1155 = vmatpush3.msra.mxu0 %v863_v15 }
 0x195   : > { %1156 = vmatprep.subr.mxu0 %v1210_v6 }
 0x196   : > { %v581_v14 = vrot.slane %v580_v13, 2 }
 0x198   : > { %v582_v17 = vadd.f32 %v581_v14, %v580_v13 }
 0x19a   : > { %v583_v18 = vrot.slane %v582_v17, 1 }
 0x19c   : > { %v584_v19 = vadd.f32 %v583_v18, %v582_v17 }
 0x19e   : > { %1112 = vmatmul.mubr.msk.f32.vlgmr.msra.gmra.mxu1 %vm496_vm1, %v584_v19 }
 0x19f   : > { %1149 = vmatprep.mubr.msk.f32.mxu1 %vm1211_vm0, %v1210_v6  ;;  %1134 = vmatpush3.msra.mxu1 %v768_v20 }
 0x1a0   : > { %1135 = vmatprep.subr.mxu1 %v1210_v6 }
 0x1a1   : > { %1136 = vmatpush3.msra.mxu1 %v767_v21 }
 0x1a2   : > { %1137 = vmatprep.subr.mxu1 %v1210_v6 }
 0x1a3   : > { %1138 = vmatpush3.msra.mxu1 %v766_v22 }
 0x1a4   : > { %1139 = vmatprep.subr.mxu1 %v1210_v6 }
 0x1a5   : > { %1140 = vmatpush3.msra.mxu1 %v765_v23 }
 0x1a6   : > { %1141 = vmatprep.subr.mxu1 %v1210_v6 }
 0x1a7   : > { %1142 = vmatpush3.msra.mxu1 %v764_v24 }
 0x1a8   : > { %1143 = vmatprep.subr.mxu1 %v1210_v6 }
 0x1a9   : > { %1144 = vmatpush3.msra.mxu1 %v763_v25 }
 0x1aa   : > { %1145 = vmatprep.subr.mxu1 %v1210_v6 }
 0x1ab   : > { %1146 = vmatpush3.msra.mxu1 %v762_v26 }
 0x1ac   : > { %1147 = vmatprep.subr.mxu1 %v1210_v6 }
 0x1ad   : > { %1148 = vmatpush3.msra.mxu1 %v761_v27 }
 0x251   : > { %v744_v28 = vpop.f32.mrf.mxu0 }
 0x253   : > { %v1132_v29 = vpop.f32.mrf.mxu0 }
 0x25e   : > { %v663_v31 = vpop.f32.mrf.mxu1 }
 0x25f   : > { %v664_v32 = vadd.f32 %v663_v31, %v593_v30 }
 0x260   : > { %v1113_v33 = vpop.f32.mrf.mxu1 }
 0x261   : > { %v751_v34 = vrot.slane %v664_v32, %v432_v16  ;;  %v862_v16 = vld [vmem:[%s1516_s10 + $0x28] sm:$0xff] }
 0x262   : > { %1157 = vmatpush3.msra.mxu0 %v862_v16 }
 0x263   : > { %v752_v35 = vadd.f32 %v751_v34, %v744_v28  ;;  %1158 = vmatprep.subr.mxu0 %v1210_v6 }
 0x264   : > { %1159 = vmatpush3.msra.mxu0 %v861_v45 }
 0x265   : > { %v754_v36 = vmin.f32 %v752_v35, 0.0  ;;  %v753_v40 = vmax.f32 %v752_v35, 0.0  ;;  %1160 = vmatprep.subr.mxu0 %v1210_v6 }
 0x266   : > { %1161 = vmatpush3.msra.mxu0 %v860_v46 }
 0x267   : > { %v755_v37 = vmul.f32 1.442695, %v754_v36  ;;  %1162 = vmatprep.subr.mxu0 %v1210_v6 }
 0x268   : > { %1163 = vmatpush3.msra.mxu0 %v859_v47 }
 0x269   : > { %1194 = vpow2.f32 %v755_v37  ;;  %1164 = vmatprep.subr.mxu0 %v1210_v6 }
 0x26a   : > { %1165 = vmatpush3.msra.mxu0 %v858_v48 }
 0x26b   : > { %1166 = vmatprep.subr.mxu0 %v1210_v6 }
 0x26c   : > { %1167 = vmatpush3.msra.mxu0 %v857_v49 }
 0x276   : > { %v1195_v38 = vpop.eup %1194 }
 0x277   : > { %v1023_v39 = vadd.f32 -1.0, %v1195_v38 }
 0x279   : > { %v758_v41 = vmul.f32 1.6732632, %v1023_v39 }
 0x27b   : > { %v759_v42 = vadd.f32 %v758_v41, %v753_v40 }
 0x27d   : > { %v760_v43 = vmul.f32 1.050701, %v759_v42 }
 0x27f   : > { %1150 = vmatmul.mubr.msk.f32.vlgmr.msra.gmra.mxu1 %vm496_vm1, %v760_v43 }
 0x33f   : > { %v845_v51 = vpop.f32.mrf.mxu1 }
 0x340   : > { %v846_v52 = vadd.f32 %v1024_v50, %v845_v51 }
 0x341   : > { %v1151_v53 = vpop.f32.mrf.mxu1 }
 0x342   : > { %v850_v54 = vmin.f32 %v846_v52, 0.0  ;;  %v849_v58 = vmax.f32 %v846_v52, 0.0 }
 0x344   : > { %v851_v55 = vmul.f32 1.442695, %v850_v54 }
 0x346   : > { %1196 = vpow2.f32 %v851_v55 }
 0x353   : > { %v1197_v56 = vpop.eup %1196 }
 0x354   : > { %v1026_v57 = vadd.f32 -1.0, %v1197_v56 }
 0x356   : > { %v854_v6 = vmul.f32 1.6732632, %v1026_v57 }
 0x358   : > { %v855_v59 = vadd.f32 %v854_v6, %v849_v58 }
 0x35a   : > { %v856_v60 = vmul.f32 1.050701, %v855_v59 }
 0x35c   : > { %1169 = vmatmul.mubr.msk.f32.vlgmr.msra.gmra.mxu0 %vm496_vm1, %v856_v60 }
 0x41c   : > { %v941_v62 = vpop.f32.mrf.mxu0 }
 0x41d   : > { %v942_v63 = vadd.f32 %v1027_v61, %v941_v62 }
 0x41e   : > { %v1170_v0 = vpop.f32.mrf.mxu0 }
 0x41f   : > { %946 = vst.msk [vmem:[%s422_s14] sm:$0xff] %vm945_vm2, %v942_v63 }
 0x420 PF: > { %s22_s21 = sadd.s32 1, %s1204_s21  }
 0x421   : > { %p19_p4 = scmp.ge.s32.totalorder %s22_s21, 4  }
 0x423   :  { %21 = sbr.rel (!%p19_p4) target bundleno = 1 (0x1), region = 101 }

</bundles_post_ra>
